<compile_context>
chip_gen: v7x
topology: tpu7x:2x2x1
jax: 0.10.0
libtpu: 0.0.40
codegen_flags: <defaults>
</compile_context>

<pallas_src>
import functools

import jax
import jax.numpy as jnp
from jax.experimental import pallas as pl
from jax.experimental.pallas import tpu as pltpu


# ------------------------- fused LSTM + Conv1d kernel ------------------------
def fused_lstm_conv_kernel(x_ref, wih_ref, whh_ref, b_ref, wconv_ref, out_ref,
                           xw_ref, hs_ref, *, seq_len, batch):
    """Single-layer unidirectional LSTM followed by a K-tap Conv1d (no bias).

    x_ref:     (B*T, D)         contiguous input view (row b*T + t), f32
    wih_ref:   (D, 4H)          W_ih^T, gate columns ordered (i, f, o, g), bf16
    whh_ref:   (H, 4H)          W_hh^T, same gate order, f32
    b_ref:     (1, 4H)          b_ih + b_hh, same gate order, f32
    wconv_ref: (K*H, C_pad)     conv weight, im2col-flattened (row k*H + h),
                                zero-padded to 128 lanes, bf16
    out_ref:   (T_out*B, C_pad) conv output (row t_out*B + b), f32
    xw_ref:    (B, T, 4H)       scratch: hoisted input projection, f32
    hs_ref:    (T*B, H)         scratch: hidden states (row t*B + b), f32
    """
    T, B = seq_len, batch
    H = whh_ref.shape[0]
    K = wconv_ref.shape[0] // H
    T_out = T - K + 1
    C_pad = wconv_ref.shape[1]

    whh = whh_ref[...]

    # Hoisted input projection: one (B*T, D) @ (D, 4H) bf16 MXU matmul with
    # f32 accumulation + bias, off the serial recurrence chain. Parked in a
    # VMEM scratch so each step just reads its (B, 4H) rows — no wrapper-side
    # time-major transpose needed.
    xw = jnp.dot(x_ref[...].astype(jnp.bfloat16), wih_ref[...],
                 preferred_element_type=jnp.float32) + b_ref[...]   # (B*T, 4H)
    xw_ref[...] = xw.reshape(B, T, 4 * H)   # row b*T+t -> [b, t, :] (tile-aligned)

    h = jnp.zeros((B, H), jnp.float32)
    c = jnp.zeros((B, H), jnp.float32)
    for t in range(T):  # fully unrolled: T is static and small
        # Serial chain per step is only h @ W_hh (f32) + gates.
        gates = xw_ref[:, t, :] + jnp.dot(h, whh,
                                          preferred_element_type=jnp.float32)
        sig = jax.nn.sigmoid(gates[:, : 3 * H])   # (i, f, o) in one wide EUP pass
        i_g = sig[:, :H]
        f_g = sig[:, H:2 * H]
        o_g = sig[:, 2 * H:]
        g_g = jnp.tanh(gates[:, 3 * H:])
        c = f_g * c + i_g * g_g
        h = o_g * jnp.tanh(c)
        hs_ref[t * B:(t + 1) * B, :] = h           # hidden states stay in VMEM

    # Conv1d as K accumulated dots over contiguous sublane windows of the
    # hidden states (replaces the T_out*K lane-concat im2col).
    # bf16 MXU inputs, f32 accumulation.
    acc = jnp.zeros((T_out * B, C_pad), jnp.float32)
    for k in range(K):
        acc = acc + jnp.dot(
            hs_ref[k * B:k * B + T_out * B, :].astype(jnp.bfloat16),
            wconv_ref[k * H:(k + 1) * H, :],
            preferred_element_type=jnp.float32)

    # Single dense, full-lane (C_pad = 128) output store — no masked vst.msk.
    out_ref[...] = acc


# ---------------------------------- wrapper ----------------------------------
@jax.jit
def auvi_subnet_forward(x, lengths, params):
    """x: (B, T, in_size) float32 -> (B, dst_feature_dims, T - K + 1)."""
    del lengths  # unused, matches the reference forward
    w_ih, w_hh, b_ih, b_hh, w_conv = (
        params["w_ih"], params["w_hh"], params["b_ih"], params["b_hh"],
        params["w_conv"])
    B, T, D = x.shape
    H = w_hh.shape[1]
    C_out, _, K = w_conv.shape
    T_out = T - K + 1
    C_pad = pl.cdiv(C_out, 128) * 128            # lane-dense output width

    # Gate-column reorder: PyTorch (i, f, g, o) -> (i, f, o, g).
    perm = jnp.concatenate([jnp.arange(0, 2 * H),
                            jnp.arange(3 * H, 4 * H),
                            jnp.arange(2 * H, 3 * H)])
    # bf16 weights feed the MXU directly (in a real model cast once at load).
    wih_t = jnp.transpose(w_ih)[:, perm].astype(jnp.bfloat16)       # (D, 4H)
    whh_t = jnp.transpose(w_hh)[:, perm].astype(jnp.float32)        # (H, 4H)
    b = (b_ih + b_hh)[perm][None, :].astype(jnp.float32)            # (1, 4H)

    # Conv weight (C_out, H, K) -> im2col-flattened (K*H, C_pad), zero-padded
    # on lanes so the kernel's output store is unmasked.
    w_flat = jnp.transpose(w_conv, (2, 1, 0)).reshape(K * H, C_out)
    w_flat = jnp.pad(w_flat, ((0, 0), (0, C_pad - C_out))).astype(jnp.bfloat16)

    # Contiguous (B*T, D) view: no XLA transpose on the activation path.
    x_flat = x.reshape(B * T, D).astype(jnp.float32)

    kernel = functools.partial(fused_lstm_conv_kernel, seq_len=T, batch=B)
    out_flat = pl.pallas_call(
        kernel,
        out_shape=jax.ShapeDtypeStruct((T_out * B, C_pad), jnp.float32),
        in_specs=[pl.BlockSpec(memory_space=pltpu.MemorySpace.VMEM)] * 5,
        out_specs=pl.BlockSpec(memory_space=pltpu.MemorySpace.VMEM),
        scratch_shapes=[pltpu.VMEM((B, T, 4 * H), jnp.float32),   # xw
                        pltpu.VMEM((T * B, H), jnp.float32)],     # hidden states
    )(x_flat, wih_t, whh_t, b, w_flat)

    # Strip lane padding; (T_out*B, C_out) -> PyTorch Conv1d NCL (B, C_out, T_out).
    out = out_flat.reshape(T_out, B, C_pad)[:, :, :C_out]
    return jnp.transpose(out, (1, 2, 0))


# ---------------------------- pure-JAX reference -----------------------------
def reference_forward(x, params):
    w_ih, w_hh, b_ih, b_hh, w_conv = (
        params["w_ih"], params["w_hh"], params["b_ih"], params["b_hh"],
        params["w_conv"])
    B, T, _ = x.shape
    H = w_hh.shape[1]
    C_out, _, K = w_conv.shape
    T_out = T - K + 1

    def step(carry, x_t):
        h, c = carry
        gates = x_t @ w_ih.T + h @ w_hh.T + b_ih + b_hh
        i = jax.nn.sigmoid(gates[:, :H])
        f = jax.nn.sigmoid(gates[:, H:2 * H])
        g = jnp.tanh(gates[:, 2 * H:3 * H])
        o = jax.nn.sigmoid(gates[:, 3 * H:])
        c = f * c + i * g
        h = o * jnp.tanh(c)
        return (h, c), h

    init = (jnp.zeros((B, H), jnp.float32), jnp.zeros((B, H), jnp.float32))
    _, hs = jax.lax.scan(step, init, jnp.transpose(x, (1, 0, 2)))
    h_bth = jnp.transpose(hs, (1, 0, 2))                            # (B, T, H)
    out = jnp.zeros((B, C_out, T_out), jnp.float32)
    for k in range(K):
        out = out + jnp.einsum("bth,ch->bct",
                               h_bth[:, k:k + T_out, :], w_conv[:, :, k])
    return out


def init_params(key, in_size, hidden_size, conv_kernel_size, dst_feature_dims):
    """Deterministic synthetic parameters with PyTorch LSTM/Conv1d shapes."""
    k1, k2, k3, k4, k5 = jax.random.split(key, 5)
    bound = 1.0 / jnp.sqrt(hidden_size)
    u = lambda k, shp: jax.random.uniform(k, shp, jnp.float32, -bound, bound)
    return {
        "w_ih": u(k1, (4 * hidden_size, in_size)),      # LSTM weight_ih_l0
        "w_hh": u(k2, (4 * hidden_size, hidden_size)),  # LSTM weight_hh_l0
        "b_ih": u(k3, (4 * hidden_size,)),              # LSTM bias_ih_l0
        "b_hh": u(k4, (4 * hidden_size,)),              # LSTM bias_hh_l0
        "w_conv": u(k5, (dst_feature_dims, hidden_size, conv_kernel_size)),
    }


if __name__ == "__main__":
    B, T = 2, 8
    in_size, hidden_size = 16, 32
    conv_kernel_size, dst_feature_dims = 3, 24

    key = jax.random.PRNGKey(0)
    kx, kp = jax.random.split(key)
    x = jax.random.normal(kx, (B, T, in_size), jnp.float32)
    lengths = jnp.full((B,), T, jnp.int32)
    params = init_params(kp, in_size, hidden_size, conv_kernel_size,
                         dst_feature_dims)

    out = auvi_subnet_forward(x, lengths, params)
    out = jax.block_until_ready(out)
    assert out.shape == (B, dst_feature_dims, T - conv_kernel_size + 1), out.shape

    ref = jax.block_until_ready(reference_forward(x, params))
    # Looser tolerance than a pure-f32 kernel: the non-recurrent matmuls feed
    # the MXU bf16 inputs (f32 accumulation), per the perf review.
    assert jnp.allclose(out, ref, atol=3e-2, rtol=3e-2), \
        float(jnp.max(jnp.abs(out - ref)))

    print("KERNEL_OK")
</pallas_src>

<mosaic_0001>
module attributes {stable_mosaic.version = 11 : i64} {
  func.func @fused_lstm_conv_kernel(%arg0: memref<16x16xf32, #tpu.memory_space<vmem>>, %arg1: memref<16x128xbf16, #tpu.memory_space<vmem>>, %arg2: memref<32x128xf32, #tpu.memory_space<vmem>>, %arg3: memref<1x128xf32, #tpu.memory_space<vmem>>, %arg4: memref<96x128xbf16, #tpu.memory_space<vmem>>, %arg5: memref<12x128xf32, #tpu.memory_space<vmem>>, %arg6: memref<2x8x128xf32, #tpu.memory_space<vmem>>, %arg7: memref<16x32xf32, #tpu.memory_space<vmem>>) attributes {dimension_semantics = [], scalar_prefetch = 0 : i64, scratch_operands = 2 : i64, tpu.core_type = #tpu.core_type<tc>} {
    %c0 = arith.constant 0 : index
    %c0_0 = arith.constant 0 : index
    %0 = vector.load %arg2[%c0, %c0_0] : memref<32x128xf32, #tpu.memory_space<vmem>>, vector<32x128xf32>
    %c0_1 = arith.constant 0 : index
    %c0_2 = arith.constant 0 : index
    %1 = vector.load %arg0[%c0_1, %c0_2] : memref<16x16xf32, #tpu.memory_space<vmem>>, vector<16x16xf32>
    %2 = arith.truncf %1 : vector<16x16xf32> to vector<16x16xbf16>
    %c0_3 = arith.constant 0 : index
    %c0_4 = arith.constant 0 : index
    %3 = vector.load %arg1[%c0_3, %c0_4] : memref<16x128xbf16, #tpu.memory_space<vmem>>, vector<16x128xbf16>
    %cst = arith.constant dense<0.000000e+00> : vector<16x128xf32>
    %4 = tpu.matmul %2, %3, %cst {dimension_numbers = #tpu.dot_dimension_numbers<[1], [0], [0], [1], [0, 0, 1, 1], [], []>} : vector<16x16xbf16>, vector<16x128xbf16>, vector<16x128xf32> -> vector<16x128xf32>
    %c0_5 = arith.constant 0 : index
    %c0_6 = arith.constant 0 : index
    %5 = vector.load %arg3[%c0_5, %c0_6] : memref<1x128xf32, #tpu.memory_space<vmem>>, vector<1x128xf32>
    %6 = vector.broadcast %5 : vector<1x128xf32> to vector<16x128xf32>
    %7 = arith.addf %4, %6 : vector<16x128xf32>
    %8 = vector.shape_cast %7 : vector<16x128xf32> to vector<2x8x128xf32>
    %c0_7 = arith.constant 0 : index
    %c0_8 = arith.constant 0 : index
    %c0_9 = arith.constant 0 : index
    %9 = vector.load %arg6[%c0_7, %c0_8, %c0_9] : memref<2x8x128xf32, #tpu.memory_space<vmem>>, vector<2x8x128xf32>
    tpu.vector_store %arg6[%c0_7, %c0_8, %c0_9], %8 {strides = array<i32>} : memref<2x8x128xf32, #tpu.memory_space<vmem>>, vector<2x8x128xf32>,
    %cst_10 = arith.constant 0.000000e+00 : f32
    %10 = vector.broadcast %cst_10 : f32 to vector<2x32xf32>
    %cst_11 = arith.constant 0.000000e+00 : f32
    %11 = vector.broadcast %cst_11 : f32 to vector<2x32xf32>
    %c0_12 = arith.constant 0 : index
    %c0_13 = arith.constant 0 : index
    %c0_14 = arith.constant 0 : index
    %12 = vector.load %arg6[%c0_12, %c0_13, %c0_14] : memref<2x8x128xf32, #tpu.memory_space<vmem>>, vector<2x1x128xf32>
    %13 = vector.shape_cast %12 : vector<2x1x128xf32> to vector<2x128xf32>
    %cst_15 = arith.constant dense<0.000000e+00> : vector<2x128xf32>
    %14 = tpu.matmul %10, %0, %cst_15 {dimension_numbers = #tpu.dot_dimension_numbers<[1], [0], [0], [1], [0, 0, 1, 1], [], []>} : vector<2x32xf32>, vector<32x128xf32>, vector<2x128xf32> -> vector<2x128xf32>
    %15 = arith.addf %13, %14 : vector<2x128xf32>
    %16 = vector.extract_strided_slice %15 {offsets = [0, 0], sizes = [2, 96], strides = [1, 1]} : vector<2x128xf32> to vector<2x96xf32>
    %17 = arith.negf %16 : vector<2x96xf32>
    %18 = math.exp %17 : vector<2x96xf32>
    %cst_16 = arith.constant 1.000000e+00 : f32
    %19 = vector.broadcast %cst_16 : f32 to vector<2x96xf32>
    %20 = arith.addf %19, %18 : vector<2x96xf32>
    %21 = arith.divf %19, %20 : vector<2x96xf32>
    %22 = vector.extract_strided_slice %21 {offsets = [0, 0], sizes = [2, 32], strides = [1, 1]} : vector<2x96xf32> to vector<2x32xf32>
    %23 = vector.extract_strided_slice %21 {offsets = [0, 32], sizes = [2, 32], strides = [1, 1]} : vector<2x96xf32> to vector<2x32xf32>
    %24 = vector.extract_strided_slice %21 {offsets = [0, 64], sizes = [2, 32], strides = [1, 1]} : vector<2x96xf32> to vector<2x32xf32>
    %25 = vector.extract_strided_slice %15 {offsets = [0, 96], sizes = [2, 32], strides = [1, 1]} : vector<2x128xf32> to vector<2x32xf32>
    %26 = math.tanh %25 : vector<2x32xf32>
    %27 = arith.mulf %23, %11 : vector<2x32xf32>
    %28 = arith.mulf %22, %26 : vector<2x32xf32>
    %29 = arith.addf %27, %28 : vector<2x32xf32>
    %30 = math.tanh %29 : vector<2x32xf32>
    %31 = arith.mulf %24, %30 : vector<2x32xf32>
    %c0_17 = arith.constant 0 : index
    %c0_18 = arith.constant 0 : index
    %32 = vector.load %arg7[%c0_17, %c0_18] : memref<16x32xf32, #tpu.memory_space<vmem>>, vector<2x32xf32>
    tpu.vector_store %arg7[%c0_17, %c0_18], %31 {strides = array<i32>} : memref<16x32xf32, #tpu.memory_space<vmem>>, vector<2x32xf32>,
    %c0_19 = arith.constant 0 : index
    %c1 = arith.constant 1 : index
    %c0_20 = arith.constant 0 : index
    %33 = vector.load %arg6[%c0_19, %c1, %c0_20] : memref<2x8x128xf32, #tpu.memory_space<vmem>>, vector<2x1x128xf32>
    %34 = vector.shape_cast %33 : vector<2x1x128xf32> to vector<2x128xf32>
    %cst_21 = arith.constant dense<0.000000e+00> : vector<2x128xf32>
    %35 = tpu.matmul %31, %0, %cst_21 {dimension_numbers = #tpu.dot_dimension_numbers<[1], [0], [0], [1], [0, 0, 1, 1], [], []>} : vector<2x32xf32>, vector<32x128xf32>, vector<2x128xf32> -> vector<2x128xf32>
    %36 = arith.addf %34, %35 : vector<2x128xf32>
    %37 = vector.extract_strided_slice %36 {offsets = [0, 0], sizes = [2, 96], strides = [1, 1]} : vector<2x128xf32> to vector<2x96xf32>
    %38 = arith.negf %37 : vector<2x96xf32>
    %39 = math.exp %38 : vector<2x96xf32>
    %cst_22 = arith.constant 1.000000e+00 : f32
    %40 = vector.broadcast %cst_22 : f32 to vector<2x96xf32>
    %41 = arith.addf %40, %39 : vector<2x96xf32>
    %42 = arith.divf %40, %41 : vector<2x96xf32>
    %43 = vector.extract_strided_slice %42 {offsets = [0, 0], sizes = [2, 32], strides = [1, 1]} : vector<2x96xf32> to vector<2x32xf32>
    %44 = vector.extract_strided_slice %42 {offsets = [0, 32], sizes = [2, 32], strides = [1, 1]} : vector<2x96xf32> to vector<2x32xf32>
    %45 = vector.extract_strided_slice %42 {offsets = [0, 64], sizes = [2, 32], strides = [1, 1]} : vector<2x96xf32> to vector<2x32xf32>
    %46 = vector.extract_strided_slice %36 {offsets = [0, 96], sizes = [2, 32], strides = [1, 1]} : vector<2x128xf32> to vector<2x32xf32>
    %47 = math.tanh %46 : vector<2x32xf32>
    %48 = arith.mulf %44, %29 : vector<2x32xf32>
    %49 = arith.mulf %43, %47 : vector<2x32xf32>
    %50 = arith.addf %48, %49 : vector<2x32xf32>
    %51 = math.tanh %50 : vector<2x32xf32>
    %52 = arith.mulf %45, %51 : vector<2x32xf32>
    %c2 = arith.constant 2 : index
    %c0_23 = arith.constant 0 : index
    %53 = vector.load %arg7[%c2, %c0_23] : memref<16x32xf32, #tpu.memory_space<vmem>>, vector<2x32xf32>
    tpu.vector_store %arg7[%c2, %c0_23], %52 {strides = array<i32>} : memref<16x32xf32, #tpu.memory_space<vmem>>, vector<2x32xf32>,
    %c0_24 = arith.constant 0 : index
    %c2_25 = arith.constant 2 : index
    %c0_26 = arith.constant 0 : index
    %54 = vector.load %arg6[%c0_24, %c2_25, %c0_26] : memref<2x8x128xf32, #tpu.memory_space<vmem>>, vector<2x1x128xf32>
    %55 = vector.shape_cast %54 : vector<2x1x128xf32> to vector<2x128xf32>
    %cst_27 = arith.constant dense<0.000000e+00> : vector<2x128xf32>
    %56 = tpu.matmul %52, %0, %cst_27 {dimension_numbers = #tpu.dot_dimension_numbers<[1], [0], [0], [1], [0, 0, 1, 1], [], []>} : vector<2x32xf32>, vector<32x128xf32>, vector<2x128xf32> -> vector<2x128xf32>
    %57 = arith.addf %55, %56 : vector<2x128xf32>
    %58 = vector.extract_strided_slice %57 {offsets = [0, 0], sizes = [2, 96], strides = [1, 1]} : vector<2x128xf32> to vector<2x96xf32>
    %59 = arith.negf %58 : vector<2x96xf32>
    %60 = math.exp %59 : vector<2x96xf32>
    %cst_28 = arith.constant 1.000000e+00 : f32
    %61 = vector.broadcast %cst_28 : f32 to vector<2x96xf32>
    %62 = arith.addf %61, %60 : vector<2x96xf32>
    %63 = arith.divf %61, %62 : vector<2x96xf32>
    %64 = vector.extract_strided_slice %63 {offsets = [0, 0], sizes = [2, 32], strides = [1, 1]} : vector<2x96xf32> to vector<2x32xf32>
    %65 = vector.extract_strided_slice %63 {offsets = [0, 32], sizes = [2, 32], strides = [1, 1]} : vector<2x96xf32> to vector<2x32xf32>
    %66 = vector.extract_strided_slice %63 {offsets = [0, 64], sizes = [2, 32], strides = [1, 1]} : vector<2x96xf32> to vector<2x32xf32>
    %67 = vector.extract_strided_slice %57 {offsets = [0, 96], sizes = [2, 32], strides = [1, 1]} : vector<2x128xf32> to vector<2x32xf32>
    %68 = math.tanh %67 : vector<2x32xf32>
    %69 = arith.mulf %65, %50 : vector<2x32xf32>
    %70 = arith.mulf %64, %68 : vector<2x32xf32>
    %71 = arith.addf %69, %70 : vector<2x32xf32>
    %72 = math.tanh %71 : vector<2x32xf32>
    %73 = arith.mulf %66, %72 : vector<2x32xf32>
    %c4 = arith.constant 4 : index
    %c0_29 = arith.constant 0 : index
    %74 = vector.load %arg7[%c4, %c0_29] : memref<16x32xf32, #tpu.memory_space<vmem>>, vector<2x32xf32>
    tpu.vector_store %arg7[%c4, %c0_29], %73 {strides = array<i32>} : memref<16x32xf32, #tpu.memory_space<vmem>>, vector<2x32xf32>,
    %c0_30 = arith.constant 0 : index
    %c3 = arith.constant 3 : index
    %c0_31 = arith.constant 0 : index
    %75 = vector.load %arg6[%c0_30, %c3, %c0_31] : memref<2x8x128xf32, #tpu.memory_space<vmem>>, vector<2x1x128xf32>
    %76 = vector.shape_cast %75 : vector<2x1x128xf32> to vector<2x128xf32>
    %cst_32 = arith.constant dense<0.000000e+00> : vector<2x128xf32>
    %77 = tpu.matmul %73, %0, %cst_32 {dimension_numbers = #tpu.dot_dimension_numbers<[1], [0], [0], [1], [0, 0, 1, 1], [], []>} : vector<2x32xf32>, vector<32x128xf32>, vector<2x128xf32> -> vector<2x128xf32>
    %78 = arith.addf %76, %77 : vector<2x128xf32>
    %79 = vector.extract_strided_slice %78 {offsets = [0, 0], sizes = [2, 96], strides = [1, 1]} : vector<2x128xf32> to vector<2x96xf32>
    %80 = arith.negf %79 : vector<2x96xf32>
    %81 = math.exp %80 : vector<2x96xf32>
    %cst_33 = arith.constant 1.000000e+00 : f32
    %82 = vector.broadcast %cst_33 : f32 to vector<2x96xf32>
    %83 = arith.addf %82, %81 : vector<2x96xf32>
    %84 = arith.divf %82, %83 : vector<2x96xf32>
    %85 = vector.extract_strided_slice %84 {offsets = [0, 0], sizes = [2, 32], strides = [1, 1]} : vector<2x96xf32> to vector<2x32xf32>
    %86 = vector.extract_strided_slice %84 {offsets = [0, 32], sizes = [2, 32], strides = [1, 1]} : vector<2x96xf32> to vector<2x32xf32>
    %87 = vector.extract_strided_slice %84 {offsets = [0, 64], sizes = [2, 32], strides = [1, 1]} : vector<2x96xf32> to vector<2x32xf32>
    %88 = vector.extract_strided_slice %78 {offsets = [0, 96], sizes = [2, 32], strides = [1, 1]} : vector<2x128xf32> to vector<2x32xf32>
    %89 = math.tanh %88 : vector<2x32xf32>
    %90 = arith.mulf %86, %71 : vector<2x32xf32>
    %91 = arith.mulf %85, %89 : vector<2x32xf32>
    %92 = arith.addf %90, %91 : vector<2x32xf32>
    %93 = math.tanh %92 : vector<2x32xf32>
    %94 = arith.mulf %87, %93 : vector<2x32xf32>
    %c6 = arith.constant 6 : index
    %c0_34 = arith.constant 0 : index
    %95 = vector.load %arg7[%c6, %c0_34] : memref<16x32xf32, #tpu.memory_space<vmem>>, vector<2x32xf32>
    tpu.vector_store %arg7[%c6, %c0_34], %94 {strides = array<i32>} : memref<16x32xf32, #tpu.memory_space<vmem>>, vector<2x32xf32>,
    %c0_35 = arith.constant 0 : index
    %c4_36 = arith.constant 4 : index
    %c0_37 = arith.constant 0 : index
    %96 = vector.load %arg6[%c0_35, %c4_36, %c0_37] : memref<2x8x128xf32, #tpu.memory_space<vmem>>, vector<2x1x128xf32>
    %97 = vector.shape_cast %96 : vector<2x1x128xf32> to vector<2x128xf32>
    %cst_38 = arith.constant dense<0.000000e+00> : vector<2x128xf32>
    %98 = tpu.matmul %94, %0, %cst_38 {dimension_numbers = #tpu.dot_dimension_numbers<[1], [0], [0], [1], [0, 0, 1, 1], [], []>} : vector<2x32xf32>, vector<32x128xf32>, vector<2x128xf32> -> vector<2x128xf32>
    %99 = arith.addf %97, %98 : vector<2x128xf32>
    %100 = vector.extract_strided_slice %99 {offsets = [0, 0], sizes = [2, 96], strides = [1, 1]} : vector<2x128xf32> to vector<2x96xf32>
    %101 = arith.negf %100 : vector<2x96xf32>
    %102 = math.exp %101 : vector<2x96xf32>
    %cst_39 = arith.constant 1.000000e+00 : f32
    %103 = vector.broadcast %cst_39 : f32 to vector<2x96xf32>
    %104 = arith.addf %103, %102 : vector<2x96xf32>
    %105 = arith.divf %103, %104 : vector<2x96xf32>
    %106 = vector.extract_strided_slice %105 {offsets = [0, 0], sizes = [2, 32], strides = [1, 1]} : vector<2x96xf32> to vector<2x32xf32>
    %107 = vector.extract_strided_slice %105 {offsets = [0, 32], sizes = [2, 32], strides = [1, 1]} : vector<2x96xf32> to vector<2x32xf32>
    %108 = vector.extract_strided_slice %105 {offsets = [0, 64], sizes = [2, 32], strides = [1, 1]} : vector<2x96xf32> to vector<2x32xf32>
    %109 = vector.extract_strided_slice %99 {offsets = [0, 96], sizes = [2, 32], strides = [1, 1]} : vector<2x128xf32> to vector<2x32xf32>
    %110 = math.tanh %109 : vector<2x32xf32>
    %111 = arith.mulf %107, %92 : vector<2x32xf32>
    %112 = arith.mulf %106, %110 : vector<2x32xf32>
    %113 = arith.addf %111, %112 : vector<2x32xf32>
    %114 = math.tanh %113 : vector<2x32xf32>
    %115 = arith.mulf %108, %114 : vector<2x32xf32>
    %c8 = arith.constant 8 : index
    %c0_40 = arith.constant 0 : index
    %116 = vector.load %arg7[%c8, %c0_40] : memref<16x32xf32, #tpu.memory_space<vmem>>, vector<2x32xf32>
    tpu.vector_store %arg7[%c8, %c0_40], %115 {strides = array<i32>} : memref<16x32xf32, #tpu.memory_space<vmem>>, vector<2x32xf32>,
    %c0_41 = arith.constant 0 : index
    %c5 = arith.constant 5 : index
    %c0_42 = arith.constant 0 : index
    %117 = vector.load %arg6[%c0_41, %c5, %c0_42] : memref<2x8x128xf32, #tpu.memory_space<vmem>>, vector<2x1x128xf32>
    %118 = vector.shape_cast %117 : vector<2x1x128xf32> to vector<2x128xf32>
    %cst_43 = arith.constant dense<0.000000e+00> : vector<2x128xf32>
    %119 = tpu.matmul %115, %0, %cst_43 {dimension_numbers = #tpu.dot_dimension_numbers<[1], [0], [0], [1], [0, 0, 1, 1], [], []>} : vector<2x32xf32>, vector<32x128xf32>, vector<2x128xf32> -> vector<2x128xf32>
    %120 = arith.addf %118, %119 : vector<2x128xf32>
    %121 = vector.extract_strided_slice %120 {offsets = [0, 0], sizes = [2, 96], strides = [1, 1]} : vector<2x128xf32> to vector<2x96xf32>
    %122 = arith.negf %121 : vector<2x96xf32>
    %123 = math.exp %122 : vector<2x96xf32>
    %cst_44 = arith.constant 1.000000e+00 : f32
    %124 = vector.broadcast %cst_44 : f32 to vector<2x96xf32>
    %125 = arith.addf %124, %123 : vector<2x96xf32>
    %126 = arith.divf %124, %125 : vector<2x96xf32>
    %127 = vector.extract_strided_slice %126 {offsets = [0, 0], sizes = [2, 32], strides = [1, 1]} : vector<2x96xf32> to vector<2x32xf32>
    %128 = vector.extract_strided_slice %126 {offsets = [0, 32], sizes = [2, 32], strides = [1, 1]} : vector<2x96xf32> to vector<2x32xf32>
    %129 = vector.extract_strided_slice %126 {offsets = [0, 64], sizes = [2, 32], strides = [1, 1]} : vector<2x96xf32> to vector<2x32xf32>
    %130 = vector.extract_strided_slice %120 {offsets = [0, 96], sizes = [2, 32], strides = [1, 1]} : vector<2x128xf32> to vector<2x32xf32>
    %131 = math.tanh %130 : vector<2x32xf32>
    %132 = arith.mulf %128, %113 : vector<2x32xf32>
    %133 = arith.mulf %127, %131 : vector<2x32xf32>
    %134 = arith.addf %132, %133 : vector<2x32xf32>
    %135 = math.tanh %134 : vector<2x32xf32>
    %136 = arith.mulf %129, %135 : vector<2x32xf32>
    %c10 = arith.constant 10 : index
    %c0_45 = arith.constant 0 : index
    %137 = vector.load %arg7[%c10, %c0_45] : memref<16x32xf32, #tpu.memory_space<vmem>>, vector<2x32xf32>
    tpu.vector_store %arg7[%c10, %c0_45], %136 {strides = array<i32>} : memref<16x32xf32, #tpu.memory_space<vmem>>, vector<2x32xf32>,
    %c0_46 = arith.constant 0 : index
    %c6_47 = arith.constant 6 : index
    %c0_48 = arith.constant 0 : index
    %138 = vector.load %arg6[%c0_46, %c6_47, %c0_48] : memref<2x8x128xf32, #tpu.memory_space<vmem>>, vector<2x1x128xf32>
    %139 = vector.shape_cast %138 : vector<2x1x128xf32> to vector<2x128xf32>
    %cst_49 = arith.constant dense<0.000000e+00> : vector<2x128xf32>
    %140 = tpu.matmul %136, %0, %cst_49 {dimension_numbers = #tpu.dot_dimension_numbers<[1], [0], [0], [1], [0, 0, 1, 1], [], []>} : vector<2x32xf32>, vector<32x128xf32>, vector<2x128xf32> -> vector<2x128xf32>
    %141 = arith.addf %139, %140 : vector<2x128xf32>
    %142 = vector.extract_strided_slice %141 {offsets = [0, 0], sizes = [2, 96], strides = [1, 1]} : vector<2x128xf32> to vector<2x96xf32>
    %143 = arith.negf %142 : vector<2x96xf32>
    %144 = math.exp %143 : vector<2x96xf32>
    %cst_50 = arith.constant 1.000000e+00 : f32
    %145 = vector.broadcast %cst_50 : f32 to vector<2x96xf32>
    %146 = arith.addf %145, %144 : vector<2x96xf32>
    %147 = arith.divf %145, %146 : vector<2x96xf32>
    %148 = vector.extract_strided_slice %147 {offsets = [0, 0], sizes = [2, 32], strides = [1, 1]} : vector<2x96xf32> to vector<2x32xf32>
    %149 = vector.extract_strided_slice %147 {offsets = [0, 32], sizes = [2, 32], strides = [1, 1]} : vector<2x96xf32> to vector<2x32xf32>
    %150 = vector.extract_strided_slice %147 {offsets = [0, 64], sizes = [2, 32], strides = [1, 1]} : vector<2x96xf32> to vector<2x32xf32>
    %151 = vector.extract_strided_slice %141 {offsets = [0, 96], sizes = [2, 32], strides = [1, 1]} : vector<2x128xf32> to vector<2x32xf32>
    %152 = math.tanh %151 : vector<2x32xf32>
    %153 = arith.mulf %149, %134 : vector<2x32xf32>
    %154 = arith.mulf %148, %152 : vector<2x32xf32>
    %155 = arith.addf %153, %154 : vector<2x32xf32>
    %156 = math.tanh %155 : vector<2x32xf32>
    %157 = arith.mulf %150, %156 : vector<2x32xf32>
    %c12 = arith.constant 12 : index
    %c0_51 = arith.constant 0 : index
    %158 = vector.load %arg7[%c12, %c0_51] : memref<16x32xf32, #tpu.memory_space<vmem>>, vector<2x32xf32>
    tpu.vector_store %arg7[%c12, %c0_51], %157 {strides = array<i32>} : memref<16x32xf32, #tpu.memory_space<vmem>>, vector<2x32xf32>,
    %c0_52 = arith.constant 0 : index
    %c7 = arith.constant 7 : index
    %c0_53 = arith.constant 0 : index
    %159 = vector.load %arg6[%c0_52, %c7, %c0_53] : memref<2x8x128xf32, #tpu.memory_space<vmem>>, vector<2x1x128xf32>
    %160 = vector.shape_cast %159 : vector<2x1x128xf32> to vector<2x128xf32>
    %cst_54 = arith.constant dense<0.000000e+00> : vector<2x128xf32>
    %161 = tpu.matmul %157, %0, %cst_54 {dimension_numbers = #tpu.dot_dimension_numbers<[1], [0], [0], [1], [0, 0, 1, 1], [], []>} : vector<2x32xf32>, vector<32x128xf32>, vector<2x128xf32> -> vector<2x128xf32>
    %162 = arith.addf %160, %161 : vector<2x128xf32>
    %163 = vector.extract_strided_slice %162 {offsets = [0, 0], sizes = [2, 96], strides = [1, 1]} : vector<2x128xf32> to vector<2x96xf32>
    %164 = arith.negf %163 : vector<2x96xf32>
    %165 = math.exp %164 : vector<2x96xf32>
    %cst_55 = arith.constant 1.000000e+00 : f32
    %166 = vector.broadcast %cst_55 : f32 to vector<2x96xf32>
    %167 = arith.addf %166, %165 : vector<2x96xf32>
    %168 = arith.divf %166, %167 : vector<2x96xf32>
    %169 = vector.extract_strided_slice %168 {offsets = [0, 0], sizes = [2, 32], strides = [1, 1]} : vector<2x96xf32> to vector<2x32xf32>
    %170 = vector.extract_strided_slice %168 {offsets = [0, 32], sizes = [2, 32], strides = [1, 1]} : vector<2x96xf32> to vector<2x32xf32>
    %171 = vector.extract_strided_slice %168 {offsets = [0, 64], sizes = [2, 32], strides = [1, 1]} : vector<2x96xf32> to vector<2x32xf32>
    %172 = vector.extract_strided_slice %162 {offsets = [0, 96], sizes = [2, 32], strides = [1, 1]} : vector<2x128xf32> to vector<2x32xf32>
    %173 = math.tanh %172 : vector<2x32xf32>
    %174 = arith.mulf %170, %155 : vector<2x32xf32>
    %175 = arith.mulf %169, %173 : vector<2x32xf32>
    %176 = arith.addf %174, %175 : vector<2x32xf32>
    %177 = math.tanh %176 : vector<2x32xf32>
    %178 = arith.mulf %171, %177 : vector<2x32xf32>
    %c14 = arith.constant 14 : index
    %c0_56 = arith.constant 0 : index
    %179 = vector.load %arg7[%c14, %c0_56] : memref<16x32xf32, #tpu.memory_space<vmem>>, vector<2x32xf32>
    tpu.vector_store %arg7[%c14, %c0_56], %178 {strides = array<i32>} : memref<16x32xf32, #tpu.memory_space<vmem>>, vector<2x32xf32>,
    %cst_57 = arith.constant 0.000000e+00 : f32
    %180 = vector.broadcast %cst_57 : f32 to vector<12x128xf32>
    %c0_58 = arith.constant 0 : index
    %c0_59 = arith.constant 0 : index
    %181 = vector.load %arg7[%c0_58, %c0_59] : memref<16x32xf32, #tpu.memory_space<vmem>>, vector<12x32xf32>
    %182 = arith.truncf %181 : vector<12x32xf32> to vector<12x32xbf16>
    %c0_60 = arith.constant 0 : index
    %c0_61 = arith.constant 0 : index
    %183 = vector.load %arg4[%c0_60, %c0_61] : memref<96x128xbf16, #tpu.memory_space<vmem>>, vector<32x128xbf16>
    %cst_62 = arith.constant dense<0.000000e+00> : vector<12x128xf32>
    %184 = tpu.matmul %182, %183, %cst_62 {dimension_numbers = #tpu.dot_dimension_numbers<[1], [0], [0], [1], [0, 0, 1, 1], [], []>} : vector<12x32xbf16>, vector<32x128xbf16>, vector<12x128xf32> -> vector<12x128xf32>
    %185 = arith.addf %180, %184 : vector<12x128xf32>
    %c2_63 = arith.constant 2 : index
    %c0_64 = arith.constant 0 : index
    %186 = vector.load %arg7[%c2_63, %c0_64] : memref<16x32xf32, #tpu.memory_space<vmem>>, vector<12x32xf32>
    %187 = arith.truncf %186 : vector<12x32xf32> to vector<12x32xbf16>
    %c32 = arith.constant 32 : index
    %c0_65 = arith.constant 0 : index
    %188 = vector.load %arg4[%c32, %c0_65] : memref<96x128xbf16, #tpu.memory_space<vmem>>, vector<32x128xbf16>
    %cst_66 = arith.constant dense<0.000000e+00> : vector<12x128xf32>
    %189 = tpu.matmul %187, %188, %cst_66 {dimension_numbers = #tpu.dot_dimension_numbers<[1], [0], [0], [1], [0, 0, 1, 1], [], []>} : vector<12x32xbf16>, vector<32x128xbf16>, vector<12x128xf32> -> vector<12x128xf32>
    %190 = arith.addf %185, %189 : vector<12x128xf32>
    %c4_67 = arith.constant 4 : index
    %c0_68 = arith.constant 0 : index
    %191 = vector.load %arg7[%c4_67, %c0_68] : memref<16x32xf32, #tpu.memory_space<vmem>>, vector<12x32xf32>
    %192 = arith.truncf %191 : vector<12x32xf32> to vector<12x32xbf16>
    %c64 = arith.constant 64 : index
    %c0_69 = arith.constant 0 : index
    %193 = vector.load %arg4[%c64, %c0_69] : memref<96x128xbf16, #tpu.memory_space<vmem>>, vector<32x128xbf16>
    %cst_70 = arith.constant dense<0.000000e+00> : vector<12x128xf32>
    %194 = tpu.matmul %192, %193, %cst_70 {dimension_numbers = #tpu.dot_dimension_numbers<[1], [0], [0], [1], [0, 0, 1, 1], [], []>} : vector<12x32xbf16>, vector<32x128xbf16>, vector<12x128xf32> -> vector<12x128xf32>
    %195 = arith.addf %190, %194 : vector<12x128xf32>
    %c0_71 = arith.constant 0 : index
    %c0_72 = arith.constant 0 : index
    %196 = vector.load %arg5[%c0_71, %c0_72] : memref<12x128xf32, #tpu.memory_space<vmem>>, vector<12x128xf32>
    tpu.vector_store %arg5[%c0_71, %c0_72], %195 {strides = array<i32>} : memref<12x128xf32, #tpu.memory_space<vmem>>, vector<12x128xf32>,
    return
  }
}

</mosaic_0001>

<bundles_post_ra>
// kernel: auvi_subnet_forward.1
= control target key start
LH: loop header
LB: loop body
LE: loop exit
PB: predicated region body
PF: predicated region fallthrough
CT: control target
= control target key end

     0   :  { %v1779_v0 = vmov 0.0   ;;  %vm1780_vm0 = vmmov 0   ;;  %v1781_v5 = vmov 0.0|0.0   ;;  %vm43_vm1 = vcmask 130048   ;;  %s1782_s6 = smov 32   ;;  %s2024_s1 = inlined_call_operand.vmem [shape: bf16[16,128], index: 1, kind: input, shape index: {}]   ;;  %s2025_s0 = inlined_call_operand.vmem [shape: f32[16,16], index: 0, kind: input, shape index: {}]   ;;  %s2026_s2 = inlined_call_operand.vmem [shape: f32[32,128], index: 2, kind: input, shape index: {}]   ;;  %s2027_s3 = inlined_call_operand.vmem [shape: f32[1,128], index: 3, kind: input, shape index: {}]   ;;  %s2028_s4 = inlined_call_operand.vmem [shape: bf16[96,128], index: 4, kind: input, shape index: {}]   ;;  %s2029_s5 = inlined_call_operand.vmem [shape: f32[12,128], index: 5, kind: output, shape index: {}]  }
   0x1   :  { %1465 = vmatprep.subr.bf16.mxu0 %v1779_v0  ;;  %v1644_v1 = vld [vmem:[%s2024_s1] sm:$0xff]   ;;  %1467 = vmatprep.mubr.msk.bf16.mxu0 %vm1780_vm0, %v1779_v0  ;;  %v26_v3 = vld [vmem:[%s2025_s0 + $0x8] sm:$0xff]  ;;  %v23_v9 = vld [vmem:[%s2026_s2 + $0x10] sm:$0xff]  ;;  %vm223_vm2 = vcmask 1041409   ;;  %vm228_vm3 = vcmask 254976   ;;  %vm92_vm4 = vcmask 261120  }
   0x2   :  { %v25_v2 = vld [vmem:[%s2025_s0] sm:$0xff]  ;;  %1595 = vmatprep.subr.bf16.mxu1 %v1781_v5  ;;  %1501 = vmatprep.mubr.msk.f32.mxu1 %vm1780_vm0, %v1779_v0  ;;  %v22_v7 = vld [vmem:[%s2026_s2 + $0x8] sm:$0xff]  ;;  %v24_v10 = vld [vmem:[%s2026_s2 + $0x18] sm:$0xff] }
   0x3   :  { %v21_v4 = vld [vmem:[%s2026_s2] sm:$0xff]  ;;  %1466 = vmatpush3.bf16.msra.mxu0 %v1644_v1  ;;  %v27_v6 = vpack.c.bf16 %v26_v3, %v25_v2  ;;  %v1846_v11 = vpack.c.bf16 %v24_v10, %v23_v9 }
   0x4   :  { %1583 = vmatprep.subr.bf16.mxu0 %v1781_v5  ;;  %v1836_v8 = vpack.c.bf16 %v22_v7, %v21_v4  ;;  %v1379_v12 = vld [vmem:[%s2027_s3] ss:$0 sm:$0xff]  ;;  %s1783_s3 = smov 64  }
   0x6   :  { %1468 = vmatmul.mubr.msk.bf16.vlgmr.msra.gmra.mrb[0].mxu0 %vm43_vm1, %v27_v6  ;;  %1597 = vmatpush3.bf16.msra.mxu1 %v1836_v8 }
   0x7   :  { %1585 = vmatpush3.bf16.msra.mxu0 %v1836_v8  ;;  %1479 = vmatprep.mubr.msk.f32.mxu0 %vm1780_vm0, %v1779_v0 }
   0x8   :  { %1586 = vmatprep.subr.bf16.mxu0 %v1781_v5  ;;  %1598 = vmatprep.subr.bf16.mxu1 %v1781_v5 }
   0xa   :  { %1600 = vmatpush3.bf16.msra.mxu1 %v1846_v11 }
   0xb   :  { %1588 = vmatpush3.bf16.msra.mxu0 %v1846_v11  ;;  %1607 = vmatprep.subr.bf16.mxu1 %v1781_v5 }
   0xc   :  { %1589 = vmatprep.subr.bf16.mxu0 %v1781_v5 }
   0xe   :  { %1480 = vmatmul.mubr.f32.vlgmr.msra.gmra.mrb[4].mxu0 %v1779_v0 }
   0xf   :  { %1591 = vmatpush3.bf16.msra.mxu0 %v1836_v8  ;;  %1490 = vmatprep.mubr.msk.f32.mxu0 %vm1780_vm0, %v1779_v0 }
  0x10   :  { %1592 = vmatprep.subr.bf16.mxu0 %v1781_v5 }
  0x13   :  { %1594 = vmatpush3.bf16.msra.mxu0 %v1846_v11 }
  0x14   :  { %1601 = vmatprep.subr.bf16.mxu0 %v1781_v5 }
  0xd9   :  { %v81_v13 = vpop.f32.mrb[0].mxu0 }
  0xda   :  { %v82_v14 = vadd.f32 %v1379_v12, %v81_v13  ;;  %v1469_v15 = vpop.f32.mrb[1].mxu0 }
  0xdb   :  { %v84_v16 = vpop.f32.mrb[2].mxu0 }
  0xdc   :  { %88 = vst [vmem:[#allocation2] sm:$0xff] %v82_v14  ;;  %v85_v17 = vadd.f32 %v1379_v12, %v84_v16  ;;  %v1470_v18 = vpop.f32.mrb[3].mxu0 }
  0xde   :  { %89 = vst [vmem:[#allocation2 + $0x8] sm:$0xff] %v85_v17 }
  0xe1   :  { %v162_v19 = vpop.f32.mrb[4].mxu0 }
  0xe2   :  { %v167_v20 = vrot.slane %v162_v19, 1  ;;  %v1481_v21 = vpop.f32.mrb[5].mxu0 }
  0xe3   :  { %v90_v23 = vld [vmem:[#allocation2] sm:$0x1]  ;;  %v230_v55 = vld [vmem:[#allocation2 + $0x1] sm:$0x1] }
  0xe4   :  { %v170_v25 = vadd.f32 %v162_v19, %v90_v23 }
  0xe5   :  { %v91_v22 = vld [vmem:[#allocation2 + $0x8] sm:$0x1]  ;;  %v231_v60 = vld [vmem:[#allocation2 + $0x9] sm:$0x1] }
  0xe6   :  { %v171_v24 = vadd.f32 %v167_v20, %v91_v22  ;;  %v1382_v29 = vmul.f32 -1.442695, %v170_v25 }
  0xe8   :  { %1651 = vtanh.f32 %v171_v24  ;;  %v1383_v28 = vmul.f32 -1.442695, %v171_v24 }
  0xe9   :  { %1653 = vtanh.f32 %v170_v25 }
  0xea   :  { %1655 = vpow2.f32 %v1383_v28 }
  0xeb   :  { %1657 = vpow2.f32 %v1382_v29 }
  0xf2   :  { %v1652_v26 = vpop.eup %1651 }
  0xf3   :  { %192 = vrot.lane.b32.xlu0 %v1652_v26, %s1782_s6  ;;  %v1654_v27 = vpop.eup %1653 }
  0xf4   :  { %v1656_v30 = vpop.eup %1655 }
  0xf5   :  { %v179_v31 = vadd.f32 1.0, %v1656_v30  ;;  %v1658_v32 = vpop.eup %1657 }
  0xf6   :  { %v178_v33 = vadd.f32 1.0, %v1658_v32 }
  0xf7   :  { %190 = vrot.lane.b32.xlu0 %v1654_v27, %s1782_s6  ;;  %1659 = vrcp.f32 %v179_v31  ;;  %v366_v31 = vld [vmem:[#allocation2 + $0x2] sm:$0x1] }
  0xf8   :  { %1661 = vrcp.f32 %v178_v33 }
 0x101   :  { %v1660_v34 = vpop.eup %1659 }
 0x102   :  { %v1662_v37 = vpop.eup %1661  ;;  %v187_v40 = vmul.f32 0.0, %v1660_v34 }
 0x103   :  { %v186_v43 = vmul.f32 0.0, %v1662_v37 }
 0x165   :  { %v193_v35 = vpop.permute.xlu0 %192 }
 0x166   :  { %v197_v36 = vmul.f32 %v1660_v34, %v193_v35 }
 0x168   :  { %202 = vrot.lane.b32.xlu1 %v197_v36, %s1782_s6  ;;  %v367_v36 = vld [vmem:[#allocation2 + $0xa] sm:$0x1] }
 0x169   :  { %v191_v38 = vpop.permute.xlu0 %190 }
 0x16a   :  { %v196_v39 = vmul.f32 %v1662_v37, %v191_v38 }
 0x16c   :  { %200 = vrot.lane.b32.xlu1 %v196_v39, %s1782_s6 }
 0x1da   :  { %v203_v41 = vpop.permute.xlu1 %202 }
 0x1db   :  { %v1870_v42 = vadd.f32 %v203_v41, %v187_v40 }
 0x1dd   :  { %1663 = vtanh.f32 %v1870_v42 }
 0x1de   :  { %v201_v44 = vpop.permute.xlu1 %200 }
 0x1df   :  { %v206_v45 = vadd.f32 %v201_v44, %v186_v43 }
 0x1e1   :  { %1665 = vtanh.f32 %v206_v45 }
 0x1e7   :  { %v1664_v46 = vpop.eup %1663 }
 0x1e8   :  { %214 = vrot.lane.b32.xlu0 %v1664_v46, %s1782_s6 }
 0x1eb   :  { %v1666_v47 = vpop.eup %1665 }
 0x1ec   :  { %212 = vrot.lane.b32.xlu1 %v1666_v47, %s1782_s6 }
 0x25a   :  { %v215_v48 = vpop.permute.xlu0 %214 }
 0x25b   :  { %v219_v49 = vmul.f32 %v1660_v34, %v215_v48 }
 0x25d   :  { %v222_v51 = vrot.slane %v219_v49, 7 }
 0x25e   :  { %v213_v50 = vpop.permute.xlu1 %212 }
 0x25f   :  { %v218_v52 = vmul.f32 %v1662_v37, %v213_v50 }
 0x261   :  { %v224_v53 = vsel %vm223_vm2, %v222_v51, %v218_v52 }
 0x262   :  { %225 = vrot.lane.b32.xlu0 %v224_v53, %s1783_s3 }
 0x2d4   :  { %v226_v54 = vpop.permute.xlu0 %225 }
 0x2d5   :  { %229 = vst.msk [vmem:[#allocation3] sm:$0x3] %vm228_vm3, %v226_v54  ;;  %1491 = vmatmul.mubr.msk.f32.vlgmr.msra.gmra.mrb[6].mxu0 %vm92_vm4, %v226_v54 }
 0x2d6   :  { %1603 = vmatpush3.bf16.msra.mxu0 %v1836_v8  ;;  %1512 = vmatprep.mubr.msk.f32.mxu0 %vm1780_vm0, %v1779_v0 }
 0x2d7   :  { %1604 = vmatprep.subr.bf16.mxu0 %v1781_v5 }
 0x2da   :  { %1606 = vmatpush3.bf16.msra.mxu0 %v1846_v11 }
 0x2db   :  { %1613 = vmatprep.subr.bf16.mxu0 %v1781_v5 }
 0x3a8   :  { %v300_v56 = vpop.f32.mrb[6].mxu0 }
 0x3a9   :  { %v305_v57 = vrot.slane %v300_v56, 1  ;;  %v308_v58 = vadd.f32 %v300_v56, %v230_v55  ;;  %v1492_v59 = vpop.f32.mrb[7].mxu0 }
 0x3ab   :  { %v309_v61 = vadd.f32 %v305_v57, %v231_v60  ;;  %1667 = vtanh.f32 %v308_v58  ;;  %v1385_v1 = vmul.f32 -1.442695, %v308_v58 }
 0x3ad   :  { %1669 = vtanh.f32 %v309_v61  ;;  %v1386_v2 = vmul.f32 -1.442695, %v309_v61 }
 0x3ae   :  { %1671 = vpow2.f32 %v1385_v1 }
 0x3af   :  { %1673 = vpow2.f32 %v1386_v2 }
 0x3b5   :  { %v1668_v62 = vpop.eup %1667 }
 0x3b6   :  { %328 = vrot.lane.b32.xlu0 %v1668_v62, %s1782_s6 }
 0x3b7   :  { %v1670_v63 = vpop.eup %1669 }
 0x3b8   :  { %330 = vrot.lane.b32.xlu1 %v1670_v63, %s1782_s6  ;;  %v1672_v3 = vpop.eup %1671 }
 0x3b9   :  { %v1674_v4 = vpop.eup %1673  ;;  %v316_v6 = vadd.f32 1.0, %v1672_v3 }
 0x3ba   :  { %v317_v7 = vadd.f32 1.0, %v1674_v4  ;;  %v502_v4 = vld [vmem:[#allocation2 + $0x3] sm:$0x1] }
 0x3bb   :  { %1675 = vrcp.f32 %v316_v6 }
 0x3bc   :  { %1677 = vrcp.f32 %v317_v7 }
 0x3c5   :  { %v1676_v9 = vpop.eup %1675 }
 0x3c6   :  { %v1678_v13 = vpop.eup %1677  ;;  %v324_v16 = vmul.f32 %v1676_v9, %v206_v45 }
 0x3c7   :  { %v325_v19 = vmul.f32 %v1678_v13, %v1870_v42 }
 0x428   :  { %v329_v10 = vpop.permute.xlu0 %328 }
 0x429   :  { %v334_v12 = vmul.f32 %v1676_v9, %v329_v10 }
 0x42a   :  { %v331_v14 = vpop.permute.xlu1 %330 }
 0x42b   :  { %338 = vrot.lane.b32.xlu0 %v334_v12, %s1782_s6  ;;  %v335_v15 = vmul.f32 %v1678_v13, %v331_v14  ;;  %v503_v12 = vld [vmem:[#allocation2 + $0xb] sm:$0x1] }
 0x42d   :  { %340 = vrot.lane.b32.xlu1 %v335_v15, %s1782_s6 }
 0x49d   :  { %v339_v17 = vpop.permute.xlu0 %338 }
 0x49e   :  { %v344_v18 = vadd.f32 %v339_v17, %v324_v16 }
 0x49f   :  { %v341_v20 = vpop.permute.xlu1 %340 }
 0x4a0   :  { %1679 = vtanh.f32 %v344_v18  ;;  %v345_v21 = vadd.f32 %v341_v20, %v325_v19 }
 0x4a2   :  { %1681 = vtanh.f32 %v345_v21 }
 0x4aa   :  { %v1680_v22 = vpop.eup %1679 }
 0x4ab   :  { %350 = vrot.lane.b32.xlu0 %v1680_v22, %s1782_s6 }
 0x4ac   :  { %v1682_v23 = vpop.eup %1681 }
 0x4ad   :  { %352 = vrot.lane.b32.xlu1 %v1682_v23, %s1782_s6 }
 0x51d   :  { %v351_v24 = vpop.permute.xlu0 %350 }
 0x51e   :  { %v356_v27 = vmul.f32 %v1676_v9, %v351_v24 }
 0x51f   :  { %v353_v25 = vpop.permute.xlu1 %352 }
 0x520   :  { %v357_v26 = vmul.f32 %v1678_v13, %v353_v25 }
 0x522   :  { %v360_v28 = vrot.slane %v357_v26, 7 }
 0x524   :  { %v361_v29 = vsel %vm223_vm2, %v360_v28, %v356_v27 }
 0x525   :  { %362 = vrot.lane.b32.xlu1 %v361_v29, %s1783_s3 }
 0x597   :  { %v363_v30 = vpop.permute.xlu1 %362 }
 0x598   :  { %365 = vst.msk [vmem:[#allocation3 + $0x2] sm:$0x3] %vm228_vm3, %v363_v30  ;;  %1502 = vmatmul.mubr.msk.f32.vlgmr.msra.gmra.mrb[0].mxu1 %vm92_vm4, %v363_v30 }
 0x599   :  { %1609 = vmatpush3.bf16.msra.mxu1 %v1836_v8  ;;  %1523 = vmatprep.mubr.msk.f32.mxu1 %vm1780_vm0, %v1779_v0 }
 0x59a   :  { %1610 = vmatprep.subr.bf16.mxu1 %v1781_v5 }
 0x59d   :  { %1612 = vmatpush3.bf16.msra.mxu1 %v1846_v11 }
 0x59e   :  { %1619 = vmatprep.subr.bf16.mxu1 %v1781_v5 }
 0x66b   :  { %v436_v32 = vpop.f32.mrb[0].mxu1 }
 0x66c   :  { %v441_v33 = vrot.slane %v436_v32, 1  ;;  %v444_v34 = vadd.f32 %v436_v32, %v366_v31  ;;  %v1503_v35 = vpop.f32.mrb[1].mxu1 }
 0x66e   :  { %v445_v37 = vadd.f32 %v441_v33, %v367_v36  ;;  %1683 = vtanh.f32 %v444_v34  ;;  %v1388_v40 = vmul.f32 -1.442695, %v444_v34 }
 0x670   :  { %1685 = vtanh.f32 %v445_v37  ;;  %v1389_v41 = vmul.f32 -1.442695, %v445_v37 }
 0x671   :  { %1687 = vpow2.f32 %v1388_v40 }
 0x672   :  { %1689 = vpow2.f32 %v1389_v41 }
 0x678   :  { %v1684_v38 = vpop.eup %1683 }
 0x679   :  { %464 = vrot.lane.b32.xlu1 %v1684_v38, %s1782_s6 }
 0x67a   :  { %v1686_v39 = vpop.eup %1685 }
 0x67b   :  { %466 = vrot.lane.b32.xlu0 %v1686_v39, %s1782_s6  ;;  %v1688_v42 = vpop.eup %1687 }
 0x67c   :  { %v1690_v43 = vpop.eup %1689  ;;  %v452_v44 = vadd.f32 1.0, %v1688_v42 }
 0x67d   :  { %v453_v45 = vadd.f32 1.0, %v1690_v43  ;;  %v638_v43 = vld [vmem:[#allocation2 + $0x4] sm:$0x1] }
 0x67e   :  { %1691 = vrcp.f32 %v452_v44 }
 0x67f   :  { %1693 = vrcp.f32 %v453_v45 }
 0x688   :  { %v1692_v46 = vpop.eup %1691 }
 0x689   :  { %v1694_v49 = vpop.eup %1693  ;;  %v460_v52 = vmul.f32 %v1692_v46, %v344_v18 }
 0x68a   :  { %v461_v55 = vmul.f32 %v1694_v49, %v345_v21 }
 0x6eb   :  { %v465_v47 = vpop.permute.xlu1 %464 }
 0x6ec   :  { %v470_v48 = vmul.f32 %v1692_v46, %v465_v47 }
 0x6ed   :  { %v467_v50 = vpop.permute.xlu0 %466 }
 0x6ee   :  { %474 = vrot.lane.b32.xlu1 %v470_v48, %s1782_s6  ;;  %v471_v51 = vmul.f32 %v1694_v49, %v467_v50  ;;  %v639_v48 = vld [vmem:[#allocation2 + $0xc] sm:$0x1] }
 0x6f0   :  { %476 = vrot.lane.b32.xlu0 %v471_v51, %s1782_s6 }
 0x760   :  { %v475_v53 = vpop.permute.xlu1 %474 }
 0x761   :  { %v480_v54 = vadd.f32 %v475_v53, %v460_v52 }
 0x762   :  { %v477_v56 = vpop.permute.xlu0 %476 }
 0x763   :  { %1695 = vtanh.f32 %v480_v54  ;;  %v481_v57 = vadd.f32 %v477_v56, %v461_v55 }
 0x765   :  { %1697 = vtanh.f32 %v481_v57 }
 0x76d   :  { %v1696_v58 = vpop.eup %1695 }
 0x76e   :  { %486 = vrot.lane.b32.xlu1 %v1696_v58, %s1782_s6 }
 0x76f   :  { %v1698_v59 = vpop.eup %1697 }
 0x770   :  { %488 = vrot.lane.b32.xlu0 %v1698_v59, %s1782_s6 }
 0x7e0   :  { %v487_v60 = vpop.permute.xlu1 %486 }
 0x7e1   :  { %v492_v63 = vmul.f32 %v1692_v46, %v487_v60 }
 0x7e2   :  { %v489_v61 = vpop.permute.xlu0 %488 }
 0x7e3   :  { %v493_v62 = vmul.f32 %v1694_v49, %v489_v61 }
 0x7e5   :  { %v496_v1 = vrot.slane %v493_v62, 7 }
 0x7e7   :  { %v497_v2 = vsel %vm223_vm2, %v496_v1, %v492_v63 }
 0x7e8   :  { %498 = vrot.lane.b32.xlu0 %v497_v2, %s1783_s3 }
 0x85a   :  { %v499_v3 = vpop.permute.xlu0 %498 }
 0x85b   :  { %501 = vst.msk [vmem:[#allocation3 + $0x4] sm:$0x3] %vm228_vm3, %v499_v3  ;;  %1513 = vmatmul.mubr.msk.f32.vlgmr.msra.gmra.mrb[8].mxu0 %vm92_vm4, %v499_v3 }
 0x85c   :  { %1615 = vmatpush3.bf16.msra.mxu0 %v1836_v8  ;;  %1534 = vmatprep.mubr.msk.f32.mxu0 %vm1780_vm0, %v1779_v0 }
 0x85d   :  { %1616 = vmatprep.subr.bf16.mxu0 %v1781_v5 }
 0x860   :  { %1618 = vmatpush3.bf16.msra.mxu0 %v1846_v11 }
 0x861   :  { %1625 = vmatprep.subr.bf16.mxu0 %v1781_v5 }
 0x92e   :  { %v572_v6 = vpop.f32.mrb[8].mxu0 }
 0x92f   :  { %v577_v7 = vrot.slane %v572_v6, 1  ;;  %v580_v9 = vadd.f32 %v572_v6, %v502_v4  ;;  %v1514_v10 = vpop.f32.mrb[9].mxu0 }
 0x931   :  { %v581_v13 = vadd.f32 %v577_v7, %v503_v12  ;;  %1699 = vtanh.f32 %v580_v9  ;;  %v1391_v16 = vmul.f32 -1.442695, %v580_v9 }
 0x933   :  { %1701 = vtanh.f32 %v581_v13  ;;  %v1392_v17 = vmul.f32 -1.442695, %v581_v13 }
 0x934   :  { %1703 = vpow2.f32 %v1391_v16 }
 0x935   :  { %1705 = vpow2.f32 %v1392_v17 }
 0x93b   :  { %v1700_v14 = vpop.eup %1699 }
 0x93c   :  { %600 = vrot.lane.b32.xlu0 %v1700_v14, %s1782_s6 }
 0x93d   :  { %v1702_v15 = vpop.eup %1701 }
 0x93e   :  { %602 = vrot.lane.b32.xlu1 %v1702_v15, %s1782_s6  ;;  %v1704_v18 = vpop.eup %1703 }
 0x93f   :  { %v1706_v19 = vpop.eup %1705  ;;  %v588_v20 = vadd.f32 1.0, %v1704_v18 }
 0x940   :  { %v589_v21 = vadd.f32 1.0, %v1706_v19  ;;  %v774_v19 = vld [vmem:[#allocation2 + $0x5] sm:$0x1] }
 0x941   :  { %1707 = vrcp.f32 %v588_v20 }
 0x942   :  { %1709 = vrcp.f32 %v589_v21 }
 0x94b   :  { %v1708_v22 = vpop.eup %1707 }
 0x94c   :  { %v1710_v25 = vpop.eup %1709  ;;  %v596_v28 = vmul.f32 %v1708_v22, %v480_v54 }
 0x94d   :  { %v597_v31 = vmul.f32 %v1710_v25, %v481_v57 }
 0x9ae   :  { %v601_v23 = vpop.permute.xlu0 %600 }
 0x9af   :  { %v606_v24 = vmul.f32 %v1708_v22, %v601_v23 }
 0x9b0   :  { %v603_v26 = vpop.permute.xlu1 %602 }
 0x9b1   :  { %610 = vrot.lane.b32.xlu0 %v606_v24, %s1782_s6  ;;  %v607_v27 = vmul.f32 %v1710_v25, %v603_v26  ;;  %v775_v24 = vld [vmem:[#allocation2 + $0xd] sm:$0x1] }
 0x9b3   :  { %612 = vrot.lane.b32.xlu1 %v607_v27, %s1782_s6 }
 0xa23   :  { %v611_v29 = vpop.permute.xlu0 %610 }
 0xa24   :  { %v616_v30 = vadd.f32 %v611_v29, %v596_v28 }
 0xa25   :  { %v613_v32 = vpop.permute.xlu1 %612 }
 0xa26   :  { %1711 = vtanh.f32 %v616_v30  ;;  %v617_v33 = vadd.f32 %v613_v32, %v597_v31 }
 0xa28   :  { %1713 = vtanh.f32 %v617_v33 }
 0xa30   :  { %v1712_v34 = vpop.eup %1711 }
 0xa31   :  { %622 = vrot.lane.b32.xlu0 %v1712_v34, %s1782_s6 }
 0xa32   :  { %v1714_v35 = vpop.eup %1713 }
 0xa33   :  { %624 = vrot.lane.b32.xlu1 %v1714_v35, %s1782_s6 }
 0xaa3   :  { %v623_v36 = vpop.permute.xlu0 %622 }
 0xaa4   :  { %v628_v39 = vmul.f32 %v1708_v22, %v623_v36 }
 0xaa5   :  { %v625_v37 = vpop.permute.xlu1 %624 }
 0xaa6   :  { %v629_v38 = vmul.f32 %v1710_v25, %v625_v37 }
 0xaa8   :  { %v632_v40 = vrot.slane %v629_v38, 7 }
 0xaaa   :  { %v633_v41 = vsel %vm223_vm2, %v632_v40, %v628_v39 }
 0xaab   :  { %634 = vrot.lane.b32.xlu1 %v633_v41, %s1783_s3 }
 0xb1d   :  { %v635_v42 = vpop.permute.xlu1 %634 }
 0xb1e   :  { %637 = vst.msk [vmem:[#allocation3 + $0x6] sm:$0x3] %vm228_vm3, %v635_v42  ;;  %1524 = vmatmul.mubr.msk.f32.vlgmr.msra.gmra.mrb[2].mxu1 %vm92_vm4, %v635_v42 }
 0xb1f   :  { %1621 = vmatpush3.bf16.msra.mxu1 %v1836_v8  ;;  %1545 = vmatprep.mubr.msk.f32.mxu1 %vm1780_vm0, %v1779_v0 }
 0xb20   :  { %1622 = vmatprep.subr.bf16.mxu1 %v1781_v5 }
 0xb23   :  { %1624 = vmatpush3.bf16.msra.mxu1 %v1846_v11 }
 0xb24   :  { %1559 = vmatprep.subr.bf16.mxu1 %v1779_v0 }
 0xbf1   :  { %v708_v44 = vpop.f32.mrb[2].mxu1 }
 0xbf2   :  { %v713_v45 = vrot.slane %v708_v44, 1  ;;  %v716_v46 = vadd.f32 %v708_v44, %v638_v43  ;;  %v1525_v47 = vpop.f32.mrb[3].mxu1 }
 0xbf4   :  { %v717_v49 = vadd.f32 %v713_v45, %v639_v48  ;;  %1715 = vtanh.f32 %v716_v46  ;;  %v1394_v52 = vmul.f32 -1.442695, %v716_v46 }
 0xbf6   :  { %1717 = vtanh.f32 %v717_v49  ;;  %v1395_v53 = vmul.f32 -1.442695, %v717_v49 }
 0xbf7   :  { %1719 = vpow2.f32 %v1394_v52  ;;  %v910_v52 = vld [vmem:[#allocation2 + $0x6] sm:$0x1] }
 0xbf8   :  { %1721 = vpow2.f32 %v1395_v53 }
 0xbfe   :  { %v1716_v50 = vpop.eup %1715 }
 0xbff   :  { %736 = vrot.lane.b32.xlu1 %v1716_v50, %s1782_s6 }
 0xc00   :  { %v1718_v51 = vpop.eup %1717 }
 0xc01   :  { %738 = vrot.lane.b32.xlu0 %v1718_v51, %s1782_s6  ;;  %v1720_v54 = vpop.eup %1719 }
 0xc02   :  { %v1722_v55 = vpop.eup %1721  ;;  %v724_v56 = vadd.f32 1.0, %v1720_v54 }
 0xc03   :  { %v725_v57 = vadd.f32 1.0, %v1722_v55 }
 0xc04   :  { %1723 = vrcp.f32 %v724_v56 }
 0xc05   :  { %1725 = vrcp.f32 %v725_v57  ;;  %v911_v57 = vld [vmem:[#allocation2 + $0xe] sm:$0x1] }
 0xc0e   :  { %v1724_v58 = vpop.eup %1723 }
 0xc0f   :  { %v1726_v61 = vpop.eup %1725  ;;  %v732_v1 = vmul.f32 %v1724_v58, %v616_v30 }
 0xc10   :  { %v733_v4 = vmul.f32 %v1726_v61, %v617_v33 }
 0xc71   :  { %v737_v59 = vpop.permute.xlu1 %736 }
 0xc72   :  { %v742_v60 = vmul.f32 %v1724_v58, %v737_v59 }
 0xc73   :  { %v739_v62 = vpop.permute.xlu0 %738 }
 0xc74   :  { %746 = vrot.lane.b32.xlu1 %v742_v60, %s1782_s6  ;;  %v743_v63 = vmul.f32 %v1726_v61, %v739_v62 }
 0xc76   :  { %748 = vrot.lane.b32.xlu0 %v743_v63, %s1782_s6 }
 0xce6   :  { %v747_v2 = vpop.permute.xlu1 %746 }
 0xce7   :  { %v752_v3 = vadd.f32 %v747_v2, %v732_v1 }
 0xce8   :  { %v749_v6 = vpop.permute.xlu0 %748 }
 0xce9   :  { %1727 = vtanh.f32 %v752_v3  ;;  %v753_v7 = vadd.f32 %v749_v6, %v733_v4 }
 0xceb   :  { %1729 = vtanh.f32 %v753_v7 }
 0xcf3   :  { %v1728_v9 = vpop.eup %1727 }
 0xcf4   :  { %758 = vrot.lane.b32.xlu1 %v1728_v9, %s1782_s6 }
 0xcf5   :  { %v1730_v10 = vpop.eup %1729 }
 0xcf6   :  { %760 = vrot.lane.b32.xlu0 %v1730_v10, %s1782_s6 }
 0xd66   :  { %v759_v12 = vpop.permute.xlu1 %758 }
 0xd67   :  { %v764_v15 = vmul.f32 %v1724_v58, %v759_v12 }
 0xd68   :  { %v761_v13 = vpop.permute.xlu0 %760 }
 0xd69   :  { %v765_v14 = vmul.f32 %v1726_v61, %v761_v13 }
 0xd6b   :  { %v768_v16 = vrot.slane %v765_v14, 7 }
 0xd6d   :  { %v769_v17 = vsel %vm223_vm2, %v768_v16, %v764_v15 }
 0xd6e   :  { %770 = vrot.lane.b32.xlu0 %v769_v17, %s1783_s3 }
 0xde0   :  { %v771_v18 = vpop.permute.xlu0 %770 }
 0xde1   :  { %773 = vst.msk [vmem:[#allocation3 + $0x8] sm:$0x3] %vm228_vm3, %v771_v18  ;;  %1535 = vmatmul.mubr.msk.f32.vlgmr.msra.gmra.mrb[10].mxu0 %vm92_vm4, %v771_v18 }
 0xde2   :  { %1627 = vmatpush3.bf16.msra.mxu0 %v1836_v8  ;;  %1556 = vmatprep.mubr.msk.f32.mxu0 %vm1780_vm0, %v1779_v0 }
 0xde3   :  { %1628 = vmatprep.subr.bf16.mxu0 %v1781_v5 }
 0xde6   :  { %1630 = vmatpush3.bf16.msra.mxu0 %v1846_v11 }
 0xeb4   :  { %v844_v20 = vpop.f32.mrb[10].mxu0 }
 0xeb5   :  { %v849_v21 = vrot.slane %v844_v20, 1  ;;  %v852_v22 = vadd.f32 %v844_v20, %v774_v19  ;;  %v1536_v23 = vpop.f32.mrb[11].mxu0 }
 0xeb7   :  { %v853_v25 = vadd.f32 %v849_v21, %v775_v24  ;;  %1731 = vtanh.f32 %v852_v22  ;;  %v1397_v27 = vmul.f32 -1.442695, %v852_v22  ;;  %v1645_v21 = vld [vmem:[%s2028_s4 + $0x10] sm:$0xff]   ;;  %v1646_v22 = vld [vmem:[%s2028_s4 + $0x18] sm:$0xff]  }
 0xeb9   :  { %1733 = vtanh.f32 %v853_v25  ;;  %v1398_v28 = vmul.f32 -1.442695, %v853_v25 }
 0xeba   :  { %1735 = vpow2.f32 %v1397_v27 }
 0xebb   :  { %1737 = vpow2.f32 %v1398_v28 }
 0xec1   :  { %v1732_v26 = vpop.eup %1731 }
 0xec2   :  { %872 = vrot.lane.b32.xlu0 %v1732_v26, %s1782_s6 }
 0xec3   :  { %v1734_v8 = vpop.eup %1733 }
 0xec4   :  { %874 = vrot.lane.b32.xlu1 %v1734_v8, %s1782_s6  ;;  %v1736_v5 = vpop.eup %1735 }
 0xec5   :  { %v1738_v11 = vpop.eup %1737  ;;  %v860_v29 = vadd.f32 1.0, %v1736_v5  ;;  %v1189_v5 = vld [vmem:[#allocation3 + $0x2] sm:$0xff] }
 0xec6   :  { %v861_v30 = vadd.f32 1.0, %v1738_v11 }
 0xec7   :  { %1739 = vrcp.f32 %v860_v29  ;;  %v1647_v29 = vld [vmem:[%s2028_s4] sm:$0xff]  }
 0xec8   :  { %1741 = vrcp.f32 %v861_v30 }
 0xed1   :  { %v1740_v31 = vpop.eup %1739 }
 0xed2   :  { %v1742_v34 = vpop.eup %1741  ;;  %v868_v37 = vmul.f32 %v1740_v31, %v752_v3 }
 0xed3   :  { %v869_v40 = vmul.f32 %v1742_v34, %v753_v7 }
 0xf34   :  { %v873_v32 = vpop.permute.xlu0 %872 }
 0xf35   :  { %v878_v33 = vmul.f32 %v1740_v31, %v873_v32 }
 0xf36   :  { %v875_v35 = vpop.permute.xlu1 %874 }
 0xf37   :  { %882 = vrot.lane.b32.xlu0 %v878_v33, %s1782_s6  ;;  %v879_v36 = vmul.f32 %v1742_v34, %v875_v35  ;;  %v1182_v33 = vld [vmem:[#allocation3] sm:$0xff]  ;;  %v1046_v35 = vld [vmem:[#allocation2 + $0x7] sm:$0x1] }
 0xf39   :  { %884 = vrot.lane.b32.xlu1 %v879_v36, %s1782_s6 }
 0xfa9   :  { %v883_v38 = vpop.permute.xlu0 %882 }
 0xfaa   :  { %v888_v39 = vadd.f32 %v883_v38, %v868_v37 }
 0xfab   :  { %v885_v41 = vpop.permute.xlu1 %884 }
 0xfac   :  { %1743 = vtanh.f32 %v888_v39  ;;  %v889_v42 = vadd.f32 %v885_v41, %v869_v40  ;;  %v1047_v40 = vld [vmem:[#allocation2 + $0xf] sm:$0x1] }
 0xfae   :  { %1745 = vtanh.f32 %v889_v42 }
 0xfb6   :  { %v1744_v43 = vpop.eup %1743 }
 0xfb7   :  { %894 = vrot.lane.b32.xlu0 %v1744_v43, %s1782_s6 }
 0xfb8   :  { %v1746_v44 = vpop.eup %1745 }
 0xfb9   :  { %896 = vrot.lane.b32.xlu1 %v1746_v44, %s1782_s6 }
0x1029   :  { %v895_v45 = vpop.permute.xlu0 %894 }
0x102a   :  { %v900_v48 = vmul.f32 %v1740_v31, %v895_v45  ;;  %v1648_v31 = vld [vmem:[%s2028_s4 + $0x8] sm:$0xff]  }
0x102b   :  { %v897_v46 = vpop.permute.xlu1 %896 }
0x102c   :  { %v901_v47 = vmul.f32 %v1742_v34, %v897_v46 }
0x102e   :  { %v904_v49 = vrot.slane %v901_v47, 7 }
0x1030   :  { %v905_v50 = vsel %vm223_vm2, %v904_v49, %v900_v48 }
0x1031   :  { %906 = vrot.lane.b32.xlu1 %v905_v50, %s1783_s3 }
0x10a3   :  { %v907_v51 = vpop.permute.xlu1 %906 }
0x10a4   :  { %909 = vst.msk [vmem:[#allocation3 + $0xa] sm:$0x3] %vm228_vm3, %v907_v51  ;;  %1546 = vmatmul.mubr.msk.f32.vlgmr.msra.gmra.mrb[4].mxu1 %vm92_vm4, %v907_v51 }
0x10a5   :  { %1563 = vmatprep.mubr.msk.bf16.mxu1 %vm1780_vm0, %v1779_v0  ;;  %1560 = vmatpush3.bf16.msra.mxu1 %v1645_v21 }
0x10a6   :  { %1561 = vmatprep.subr.bf16.mxu1 %v1779_v0 }
0x10a9   :  { %1562 = vmatpush3.bf16.msra.mxu1 %v1646_v22 }
0x10aa   :  { %1567 = vmatprep.subr.bf16.mxu1 %v1779_v0 }
0x10ab   :  { %v1183_v32 = vld [vmem:[#allocation3 + $0x8] sm:$0xf] }
0x10ac   :  { %v1184_v34 = vpack.c.bf16 %v1183_v32, %v1182_v33 }
0x1177   :  { %v980_v53 = vpop.f32.mrb[4].mxu1 }
0x1178   :  { %v985_v54 = vrot.slane %v980_v53, 1  ;;  %v988_v55 = vadd.f32 %v980_v53, %v910_v52  ;;  %v1547_v56 = vpop.f32.mrb[5].mxu1 }
0x117a   :  { %v989_v58 = vadd.f32 %v985_v54, %v911_v57  ;;  %1747 = vtanh.f32 %v988_v55  ;;  %v1400_v61 = vmul.f32 -1.442695, %v988_v55 }
0x117c   :  { %1749 = vtanh.f32 %v989_v58  ;;  %v1401_v62 = vmul.f32 -1.442695, %v989_v58 }
0x117d   :  { %1751 = vpow2.f32 %v1400_v61 }
0x117e   :  { %1753 = vpow2.f32 %v1401_v62  ;;  %v1649_v62 = vld [vmem:[%s2028_s4 + $0x20] sm:$0xff]  }
0x1184   :  { %v1748_v59 = vpop.eup %1747 }
0x1185   :  { %1008 = vrot.lane.b32.xlu1 %v1748_v59, %s1782_s6 }
0x1186   :  { %v1750_v60 = vpop.eup %1749 }
0x1187   :  { %1010 = vrot.lane.b32.xlu0 %v1750_v60, %s1782_s6  ;;  %v1752_v63 = vpop.eup %1751 }
0x1188   :  { %v1754_v1 = vpop.eup %1753  ;;  %v996_v2 = vadd.f32 1.0, %v1752_v63 }
0x1189   :  { %v997_v3 = vadd.f32 1.0, %v1754_v1 }
0x118a   :  { %1755 = vrcp.f32 %v996_v2  ;;  %v1650_v2 = vld [vmem:[%s2028_s4 + $0x28] sm:$0xff]  }
0x118b   :  { %1757 = vrcp.f32 %v997_v3 }
0x1194   :  { %v1756_v4 = vpop.eup %1755 }
0x1195   :  { %v1758_v9 = vpop.eup %1757  ;;  %v1004_v13 = vmul.f32 %v1756_v4, %v888_v39 }
0x1196   :  { %v1005_v16 = vmul.f32 %v1758_v9, %v889_v42 }
0x11f7   :  { %v1009_v6 = vpop.permute.xlu1 %1008 }
0x11f8   :  { %v1014_v7 = vmul.f32 %v1756_v4, %v1009_v6 }
0x11f9   :  { %v1011_v10 = vpop.permute.xlu0 %1010 }
0x11fa   :  { %1018 = vrot.lane.b32.xlu1 %v1014_v7, %s1782_s6  ;;  %v1015_v12 = vmul.f32 %v1758_v9, %v1011_v10 }
0x11fc   :  { %1020 = vrot.lane.b32.xlu0 %v1015_v12, %s1782_s6  ;;  %v1308_v12 = vld [vmem:[#allocation3 + $0x4] sm:$0xff] }
0x126c   :  { %v1019_v14 = vpop.permute.xlu1 %1018 }
0x126d   :  { %v1965_v15 = vadd.f32 %v1019_v14, %v1004_v13 }
0x126e   :  { %v1021_v17 = vpop.permute.xlu0 %1020 }
0x126f   :  { %1759 = vtanh.f32 %v1965_v15  ;;  %v1968_v18 = vadd.f32 %v1021_v17, %v1005_v16 }
0x1271   :  { %1761 = vtanh.f32 %v1968_v18 }
0x1279   :  { %v1760_v19 = vpop.eup %1759 }
0x127a   :  { %1030 = vrot.lane.b32.xlu1 %v1760_v19, %s1782_s6 }
0x127b   :  { %v1762_v20 = vpop.eup %1761 }
0x127c   :  { %1032 = vrot.lane.b32.xlu0 %v1762_v20, %s1782_s6 }
0x12ec   :  { %v1031_v23 = vpop.permute.xlu1 %1030 }
0x12ed   :  { %v1036_v26 = vmul.f32 %v1756_v4, %v1031_v23 }
0x12ee   :  { %v1033_v24 = vpop.permute.xlu0 %1032 }
0x12ef   :  { %v1037_v25 = vmul.f32 %v1758_v9, %v1033_v24 }
0x12f1   :  { %v1040_v8 = vrot.slane %v1037_v25, 7 }
0x12f3   :  { %v1041_v27 = vsel %vm223_vm2, %v1040_v8, %v1036_v26 }
0x12f4   :  { %1042 = vrot.lane.b32.xlu0 %v1041_v27, %s1783_s3 }
0x1366   :  { %v1043_v28 = vpop.permute.xlu0 %1042 }
0x1367   :  { %1045 = vst.msk [vmem:[#allocation3 + $0xc] sm:$0x3] %vm228_vm3, %v1043_v28  ;;  %1557 = vmatmul.mubr.msk.f32.vlgmr.msra.gmra.mrb[12].mxu0 %vm92_vm4, %v1043_v28 }
0x136e   :  { %v1190_v11 = vld [vmem:[#allocation3 + $0xa] sm:$0xf] }
0x136f   :  { %v1191_v30 = vpack.c.bf16 %v1190_v11, %v1189_v5 }
0x1371   :  { %1564 = vmatmul.mubr.msk.bf16.vlgmr.msra.gmra.mrb[8].mxu1 %vm92_vm4, %v1191_v30 }
0x1372   :  { %1568 = vmatpush3.bf16.msra.mxu1 %v1647_v29  ;;  %1571 = vmatprep.mubr.msk.bf16.mxu1 %vm1780_vm0, %v1779_v0 }
0x1373   :  { %1569 = vmatprep.subr.bf16.mxu1 %v1779_v0 }
0x1376   :  { %1570 = vmatpush3.bf16.msra.mxu1 %v1648_v31 }
0x1377   :  { %1575 = vmatprep.subr.bf16.mxu1 %v1779_v0 }
0x137d   :  { %1572 = vmatmul.mubr.msk.bf16.vlgmr.msra.gmra.mrb[8].mxu1 %vm92_vm4, %v1184_v34 }
0x137e   :  { %1579 = vmatprep.mubr.msk.bf16.mxu1 %vm1780_vm0, %v1779_v0  ;;  %1576 = vmatpush3.bf16.msra.mxu1 %v1649_v62 }
0x137f   :  { %1577 = vmatprep.subr.bf16.mxu1 %v1779_v0 }
0x1382   :  { %1578 = vmatpush3.bf16.msra.mxu1 %v1650_v2 }
0x143a   :  { %v1116_v36 = vpop.f32.mrb[12].mxu0 }
0x143b   :  { %v1121_v37 = vrot.slane %v1116_v36, 1  ;;  %v1124_v38 = vadd.f32 %v1116_v36, %v1046_v35  ;;  %v1558_v39 = vpop.f32.mrb[13].mxu0 }
0x143d   :  { %v1125_v41 = vadd.f32 %v1121_v37, %v1047_v40  ;;  %1763 = vtanh.f32 %v1124_v38  ;;  %v1403_v44 = vmul.f32 -1.442695, %v1124_v38 }
0x143f   :  { %1765 = vtanh.f32 %v1125_v41  ;;  %v1404_v45 = vmul.f32 -1.442695, %v1125_v41 }
0x1440   :  { %1767 = vpow2.f32 %v1403_v44 }
0x1441   :  { %1769 = vpow2.f32 %v1404_v45 }
0x1447   :  { %v1764_v42 = vpop.eup %1763 }
0x1448   :  { %1144 = vrot.lane.b32.xlu0 %v1764_v42, %s1782_s6 }
0x1449   :  { %v1766_v43 = vpop.eup %1765 }
0x144a   :  { %1146 = vrot.lane.b32.xlu1 %v1766_v43, %s1782_s6  ;;  %v1768_v46 = vpop.eup %1767 }
0x144b   :  { %v1770_v47 = vpop.eup %1769  ;;  %v1132_v48 = vadd.f32 1.0, %v1768_v46 }
0x144c   :  { %v1133_v49 = vadd.f32 1.0, %v1770_v47 }
0x144d   :  { %1771 = vrcp.f32 %v1132_v48 }
0x144e   :  { %1773 = vrcp.f32 %v1133_v49 }
0x1457   :  { %v1772_v50 = vpop.eup %1771 }
0x1458   :  { %v1774_v53 = vpop.eup %1773  ;;  %v1140_v56 = vmul.f32 %v1772_v50, %v1965_v15 }
0x1459   :  { %v1141_v59 = vmul.f32 %v1774_v53, %v1968_v18 }
0x14ba   :  { %v1145_v51 = vpop.permute.xlu0 %1144 }
0x14bb   :  { %v1150_v52 = vmul.f32 %v1772_v50, %v1145_v51 }
0x14bc   :  { %v1147_v54 = vpop.permute.xlu1 %1146 }
0x14bd   :  { %1154 = vrot.lane.b32.xlu0 %v1150_v52, %s1782_s6  ;;  %v1151_v55 = vmul.f32 %v1774_v53, %v1147_v54 }
0x14bf   :  { %1156 = vrot.lane.b32.xlu1 %v1151_v55, %s1782_s6 }
0x152f   :  { %v1155_v57 = vpop.permute.xlu0 %1154 }
0x1530   :  { %v1160_v58 = vadd.f32 %v1155_v57, %v1140_v56 }
0x1531   :  { %v1157_v60 = vpop.permute.xlu1 %1156 }
0x1532   :  { %1775 = vtanh.f32 %v1160_v58  ;;  %v1161_v61 = vadd.f32 %v1157_v60, %v1141_v59 }
0x1534   :  { %1777 = vtanh.f32 %v1161_v61 }
0x153c   :  { %v1776_v63 = vpop.eup %1775 }
0x153d   :  { %1166 = vrot.lane.b32.xlu0 %v1776_v63, %s1782_s6 }
0x153e   :  { %v1778_v1 = vpop.eup %1777 }
0x153f   :  { %1168 = vrot.lane.b32.xlu1 %v1778_v1, %s1782_s6 }
0x15af   :  { %v1167_v3 = vpop.permute.xlu0 %1166 }
0x15b0   :  { %v1172_v7 = vmul.f32 %v1772_v50, %v1167_v3 }
0x15b1   :  { %v1169_v4 = vpop.permute.xlu1 %1168 }
0x15b2   :  { %v1173_v6 = vmul.f32 %v1774_v53, %v1169_v4 }
0x15b4   :  { %v1176_v9 = vrot.slane %v1173_v6, 7 }
0x15b6   :  { %v1177_v10 = vsel %vm223_vm2, %v1176_v9, %v1172_v7 }
0x15b7   :  { %1178 = vrot.lane.b32.xlu1 %v1177_v10, %s1783_s3 }
0x1629   :  { %v1179_v0 = vpop.permute.xlu1 %1178 }
0x162a   :  { %1181 = vst.msk [vmem:[#allocation3 + $0xe] sm:$0x3] %vm228_vm3, %v1179_v0 }
0x1631   :  { %v1309_v13 = vld [vmem:[#allocation3 + $0xc] sm:$0xf] }
0x1632   :  { %v1310_v14 = vpack.c.bf16 %v1309_v13, %v1308_v12 }
0x1634   :  { %1580 = vmatmul.mubr.msk.bf16.vlgmr.msra.gmra.mrb[8].mxu1 %vm92_vm4, %v1310_v14 }
0x1707   :  { %v1364_v15 = vpop.f32.mrb[8].mxu1 }
0x1708   :  { %1373 = vst [vmem:[%s2029_s5] sm:$0xff] %v1364_v15  ;;  %v1581_v16 = vpop.f32.mrb[9].mxu1 }
0x1709   :  { %v1367_v17 = vpop.f32.mrb[10].mxu1 }
0x170a   :  { %1374 = vst [vmem:[%s2029_s5 + $0x8] sm:$0xf] %v1367_v17  ;;  %v1582_v18 = vpop.f32.mrb[11].mxu1 }

</bundles_post_ra>
